<compile_context>
chip_gen: v5e
topology: v5e:2x2
jax: 0.10.0
libtpu: 0.0.40
codegen_flags: <defaults>
</compile_context>

<pallas_src>
import math

import jax
import jax.numpy as jnp
from jax.experimental import pallas as pl
from jax.experimental.pallas import tpu as pltpu

_C0 = math.sqrt(2.0 / math.pi)          # sqrt(2/pi)
_C1 = _C0 * 0.044715                    # folded coefficient


def _gelu_tanh_kernel(x_ref, o_ref):
    x = x_ref[...].astype(jnp.float32)
    # gelu(x, approximate='tanh') = 0.5*x*(1 + tanh(sqrt(2/pi)*(x + 0.044715*x^3)))
    # folded: inner = x * (C0 + C1*x*x)
    inner = x * (_C0 + _C1 * (x * x))
    y = 0.5 * x * (1.0 + jnp.tanh(inner))
    o_ref[...] = y.astype(o_ref.dtype)


def gelu_tanh(x: jax.Array, *, target_block_bytes: int = 2 << 20) -> jax.Array:
    """Tanh-approximate GELU computed in a Pallas TPU kernel.

    The input is viewed as a lane-dense 2-D slab (widest lane dim that divides
    the element count, no pad/crop in that case) and processed in ~2 MiB blocks
    on the VPU/EUP.
    """
    orig_shape = x.shape
    orig_dtype = x.dtype
    n = x.size
    if n == 0:
        return x

    dtype_bytes = jnp.dtype(orig_dtype).itemsize

    # ---- choose a lane-dense layout; avoid pad/crop whenever possible -------
    n_cols = 0
    for cols in (2048, 1024, 512, 256, 128):
        if n % cols == 0:
            n_cols = cols
            break

    if n_cols:
        pad_elems = 0
        slab = x.reshape(n // n_cols, n_cols)          # free reshape, no extra HBM pass
    else:
        # Ragged fallback: single pad-to-128 pass. gelu(0) == 0 so padding is safe.
        n_cols = 128
        pad_elems = (-n) % n_cols
        slab = jnp.pad(jnp.ravel(x), (0, pad_elems)).reshape(-1, n_cols)

    n_rows = slab.shape[0]

    # ---- pick a row tile targeting ~target_block_bytes per block ------------
    if n_rows <= 8:
        row_tile = n_rows                              # full-extent (tiny input)
    else:
        target_rows = max(8, target_block_bytes // (n_cols * dtype_bytes))
        row_tile = min(target_rows, n_rows)
        row_tile -= row_tile % 8                       # sublane-aligned (>= 8 here)

    num_blocks = pl.cdiv(n_rows, row_tile)
    # Ensure >= 2 grid steps when there is enough work, so the pipeline can
    # overlap DMA/compute and both v7x TensorCores are used.
    if num_blocks == 1 and n_rows >= 16:
        row_tile = ((n_rows + 1) // 2 + 7) // 8 * 8
        num_blocks = pl.cdiv(n_rows, row_tile)

    out = pl.pallas_call(
        _gelu_tanh_kernel,
        out_shape=jax.ShapeDtypeStruct((n_rows, n_cols), orig_dtype),
        grid_spec=pltpu.PrefetchScalarGridSpec(
            num_scalar_prefetch=0,
            grid=(int(num_blocks),),
            in_specs=[pl.BlockSpec((row_tile, n_cols), lambda i: (i, 0))],
            out_specs=pl.BlockSpec((row_tile, n_cols), lambda i: (i, 0)),
        ),
        compiler_params=pltpu.CompilerParams(
            dimension_semantics=("parallel",),
        ),
    )(slab)

    if pad_elems:
        return out.reshape(-1)[:n].reshape(orig_shape)
    return out.reshape(orig_shape)


def gelu_tanh_ref(x: jax.Array) -> jax.Array:
    xf = x.astype(jnp.float32)
    y = 0.5 * xf * (1.0 + jnp.tanh(_C0 * (xf + 0.044715 * xf**3)))
    return y.astype(x.dtype)


if __name__ == "__main__":
    key = jax.random.PRNGKey(0)

    # Activation-like shape (batch=2, seq=8, hidden=1024): hits the no-pad,
    # wide-lane fast path.
    x1 = jax.random.normal(key, (2, 8, 1024), dtype=jnp.float32)
    # Ragged shape: exercises the padded fallback path.
    x2 = 3.0 * jax.random.normal(jax.random.fold_in(key, 1), (3, 7, 5), dtype=jnp.float32)

    gelu = jax.jit(gelu_tanh)
    for x in (x1, x2):
        y = jax.block_until_ready(gelu(x))
        y_ref = jax.block_until_ready(gelu_tanh_ref(x))
        assert y.shape == x.shape and y.dtype == x.dtype
        err = float(jnp.max(jnp.abs(y - y_ref)))
        assert err < 1e-5, f"max abs error {err}"

    print("KERNEL_OK")
</pallas_src>

<mosaic_0001>
module attributes {stable_mosaic.version = 11 : i64} {
  func.func @_gelu_tanh_kernel(%arg0: i32, %arg1: memref<8x2048xf32, #tpu.memory_space<vmem>>, %arg2: memref<8x2048xf32, #tpu.memory_space<vmem>>) attributes {dimension_semantics = [#tpu.dimension_semantics<parallel>], iteration_bounds = array<i64: 1>, scalar_prefetch = 0 : i64, scratch_operands = 0 : i64, tpu.core_type = #tpu.core_type<tc>, window_params = [{transform_indices = @transform_0, window_bounds = array<i64: 8, 2048>}, {transform_indices = @transform_1, window_bounds = array<i64: 8, 2048>}]} {
    %c0 = arith.constant 0 : index
    %c0_0 = arith.constant 0 : index
    %0 = vector.load %arg1[%c0, %c0_0] : memref<8x2048xf32, #tpu.memory_space<vmem>>, vector<8x2048xf32>
    %1 = arith.mulf %0, %0 : vector<8x2048xf32>
    %cst = arith.constant 0.0356774069 : f32
    %2 = vector.broadcast %cst : f32 to vector<8x2048xf32>
    %3 = arith.mulf %2, %1 : vector<8x2048xf32>
    %cst_1 = arith.constant 0.797884583 : f32
    %4 = vector.broadcast %cst_1 : f32 to vector<8x2048xf32>
    %5 = arith.addf %4, %3 : vector<8x2048xf32>
    %6 = arith.mulf %0, %5 : vector<8x2048xf32>
    %cst_2 = arith.constant 5.000000e-01 : f32
    %7 = vector.broadcast %cst_2 : f32 to vector<8x2048xf32>
    %8 = arith.mulf %7, %0 : vector<8x2048xf32>
    %9 = math.tanh %6 : vector<8x2048xf32>
    %cst_3 = arith.constant 1.000000e+00 : f32
    %10 = vector.broadcast %cst_3 : f32 to vector<8x2048xf32>
    %11 = arith.addf %10, %9 : vector<8x2048xf32>
    %12 = arith.mulf %8, %11 : vector<8x2048xf32>
    %c0_4 = arith.constant 0 : index
    %c0_5 = arith.constant 0 : index
    %13 = vector.load %arg2[%c0_4, %c0_5] : memref<8x2048xf32, #tpu.memory_space<vmem>>, vector<8x2048xf32>
    tpu.vector_store %arg2[%c0_4, %c0_5], %12 {strides = array<i32>} : memref<8x2048xf32, #tpu.memory_space<vmem>>, vector<8x2048xf32>,
    return
  }
  func.func @transform_0(%arg0: i32) -> (i32, i32) {
    %c0_i32 = arith.constant 0 : i32
    %c0_i32_0 = arith.constant 0 : i32
    return %arg0, %c0_i32 : i32, i32
  }
  func.func @transform_1(%arg0: i32) -> (i32, i32) {
    %c0_i32 = arith.constant 0 : i32
    %c0_i32_0 = arith.constant 0 : i32
    return %arg0, %c0_i32 : i32, i32
  }
}

</mosaic_0001>

<bundles_post_ra>
// kernel: gelu_tanh.1
= control target key start
LH: loop header
LB: loop body
LE: loop exit
PB: predicated region body
PF: predicated region fallthrough
CT: control target
= control target key end

     0   :  { %s349_s0 = inlined_call_operand.vmem [shape: f32[8,2048], index: 0, kind: input, shape index: {}]   ;;  %s350_s1 = inlined_call_operand.vmem [shape: f32[8,2048], index: 1, kind: output, shape index: {}]  }
   0x1   :  { %v8_v0 = vld [vmem:[%s349_s0] sm:$0xff]  ;;  %v9_v1 = vld [vmem:[%s349_s0 + $0x8] sm:$0xff]  ;;  %v10_v2 = vld [vmem:[%s349_s0 + $0x10] sm:$0xff] }
   0x2   :  { %v24_v3 = vmul.f32 %v8_v0, %v8_v0  ;;  %v25_v4 = vmul.f32 %v9_v1, %v9_v1  ;;  %v11_v5 = vld [vmem:[%s349_s0 + $0x18] sm:$0xff]  ;;  %v12_v6 = vld [vmem:[%s349_s0 + $0x20] sm:$0xff]  ;;  %v13_v7 = vld [vmem:[%s349_s0 + $0x28] sm:$0xff]  ;;  %v26_v8 = vmul.f32 %v10_v2, %v10_v2  ;;  %v238_v15 = vmul.f32 0.5, %v8_v0 }
   0x3   :  { %v27_v9 = vmul.f32 %v11_v5, %v11_v5  ;;  %v14_v10 = vld [vmem:[%s349_s0 + $0x30] sm:$0xff]  ;;  %v28_v13 = vmul.f32 %v12_v6, %v12_v6  ;;  %v15_v14 = vld [vmem:[%s349_s0 + $0x38] sm:$0xff]  ;;  %v29_v18 = vmul.f32 %v13_v7, %v13_v7  ;;  %v243_v31 = vld [vmem:[%s349_s0 + $0x40] sm:$0xff]  ;;  %v89_v32 = vmul.f32 0.5, %v9_v1 }
   0x4   :  { %v40_v11 = vmul.f32 0.035677407, %v24_v3  ;;  %v41_v12 = vmul.f32 0.035677407, %v25_v4  ;;  %v42_v16 = vmul.f32 0.035677407, %v26_v8  ;;  %v30_v22 = vmul.f32 %v14_v10, %v14_v10 }
   0x5   :  { %v43_v17 = vmul.f32 0.035677407, %v27_v9  ;;  %v44_v21 = vmul.f32 0.035677407, %v28_v13  ;;  %v45_v25 = vmul.f32 0.035677407, %v29_v18  ;;  %v31_v26 = vmul.f32 %v15_v14, %v15_v14 }
   0x6   :  { %v56_v19 = vadd.f32 0.7978846, %v40_v11  ;;  %v57_v20 = vadd.f32 0.7978846, %v41_v12  ;;  %v58_v23 = vadd.f32 0.7978846, %v42_v16  ;;  %v32_v42 = vmul.f32 %v243_v31, %v243_v31 }
   0x7   :  { %v59_v24 = vadd.f32 0.7978846, %v43_v17  ;;  %v60_v29 = vadd.f32 0.7978846, %v44_v21  ;;  %v46_v30 = vmul.f32 0.035677407, %v30_v22 }
   0x8   :  { %v72_v27 = vmul.f32 %v56_v19, %v8_v0  ;;  %v73_v28 = vmul.f32 %v57_v20, %v9_v1  ;;  %v74_v33 = vmul.f32 %v58_v23, %v10_v2  ;;  %v61_v35 = vadd.f32 0.7978846, %v45_v25  ;;  %v248_v39 = vld [vmem:[%s349_s0 + $0x48] sm:$0xff]  ;;  %v255_v43 = vld [vmem:[%s349_s0 + $0x50] sm:$0xff]  ;;  %v260_v47 = vld [vmem:[%s349_s0 + $0x58] sm:$0xff] }
   0x9   :  { %v75_v34 = vmul.f32 %v59_v24, %v11_v5  ;;  %v76_v36 = vmul.f32 %v60_v29, %v12_v6  ;;  %v62_v37 = vadd.f32 0.7978846, %v46_v30  ;;  %v47_v38 = vmul.f32 0.035677407, %v31_v26  ;;  %v267_v51 = vld [vmem:[%s349_s0 + $0x60] sm:$0xff]  ;;  %v282_v18 = vld [vmem:[%s349_s0 + $0x68] sm:$0xff] }
   0xa   :  { %172 = vtanh.f32 %v72_v27  ;;  %v90_v40 = vmul.f32 0.5, %v10_v2  ;;  %v77_v41 = vmul.f32 %v61_v35, %v13_v7  ;;  %v91_v44 = vmul.f32 0.5, %v11_v5  ;;  %v22_v25 = vld [vmem:[%s349_s0 + $0x70] sm:$0xff] }
   0xb   :  { %174 = vtanh.f32 %v73_v28  ;;  %v78_v45 = vmul.f32 %v62_v37, %v14_v10  ;;  %v63_v46 = vadd.f32 0.7978846, %v47_v38  ;;  %v92_v48 = vmul.f32 0.5, %v12_v6 }
   0xc   :  { %176 = vtanh.f32 %v74_v33  ;;  %v48_v49 = vmul.f32 0.035677407, %v32_v42  ;;  %v33_v50 = vmul.f32 %v248_v39, %v248_v39  ;;  %v93_v52 = vmul.f32 0.5, %v13_v7 }
   0xd   :  { %178 = vtanh.f32 %v75_v34  ;;  %v79_v53 = vmul.f32 %v63_v46, %v15_v14  ;;  %v34_v54 = vmul.f32 %v255_v43, %v255_v43  ;;  %v35_v57 = vmul.f32 %v260_v47, %v260_v47 }
   0xe   :  { %180 = vtanh.f32 %v76_v36  ;;  %v64_v55 = vadd.f32 0.7978846, %v48_v49  ;;  %v49_v56 = vmul.f32 0.035677407, %v33_v50  ;;  %v94_v59 = vmul.f32 0.5, %v14_v10 }
   0xf   :  { %182 = vtanh.f32 %v77_v41  ;;  %v50_v60 = vmul.f32 0.035677407, %v34_v54  ;;  %v36_v61 = vmul.f32 %v267_v51, %v267_v51  ;;  %v95_v4 = vmul.f32 0.5, %v15_v14 }
  0x10   :  { %v173_v58 = vpop.eup %172  ;;  %184 = vtanh.f32 %v78_v45  ;;  %v80_v0 = vmul.f32 %v64_v55, %v243_v31  ;;  %v65_v1 = vadd.f32 0.7978846, %v49_v56  ;;  %v51_v6 = vmul.f32 0.035677407, %v35_v57 }
  0x11   :  { %v175_v62 = vpop.eup %174  ;;  %v120_v63 = vadd.f32 1.0, %v173_v58  ;;  %186 = vtanh.f32 %v79_v53  ;;  %v66_v5 = vadd.f32 0.7978846, %v50_v60  ;;  %v52_v20 = vmul.f32 0.035677407, %v36_v61 }
  0x12   :  { %v177_v2 = vpop.eup %176  ;;  %v121_v3 = vadd.f32 1.0, %v175_v62  ;;  %188 = vtanh.f32 %v80_v0  ;;  %v81_v10 = vmul.f32 %v65_v1, %v248_v39  ;;  %v67_v17 = vadd.f32 0.7978846, %v51_v6 }
  0x13   :  { %v179_v7 = vpop.eup %178  ;;  %v136_v8 = vmul.f32 %v120_v63, %v238_v15  ;;  %v122_v9 = vadd.f32 1.0, %v177_v2  ;;  %v82_v16 = vmul.f32 %v66_v5, %v255_v43  ;;  %v68_v29 = vadd.f32 0.7978846, %v52_v20 }
  0x14   :  { %v181_v11 = vpop.eup %180  ;;  %v137_v12 = vmul.f32 %v121_v3, %v89_v32  ;;  %v123_v13 = vadd.f32 1.0, %v179_v7  ;;  %190 = vtanh.f32 %v81_v10  ;;  %v83_v24 = vmul.f32 %v67_v17, %v260_v47  ;;  %v23_v32 = vld [vmem:[%s349_s0 + $0x78] sm:$0xff] }
  0x15   :  { %v183_v14 = vpop.eup %182  ;;  %152 = vst [vmem:[%s350_s1] sm:$0xff] %v136_v8  ;;  %v138_v15 = vmul.f32 %v122_v9, %v90_v40  ;;  %v124_v19 = vadd.f32 1.0, %v181_v11  ;;  %192 = vtanh.f32 %v82_v16  ;;  %v37_v30 = vmul.f32 %v282_v18, %v282_v18 }
  0x16   :  { %v185_v21 = vpop.eup %184  ;;  %153 = vst [vmem:[%s350_s1 + $0x8] sm:$0xff] %v137_v12  ;;  %v139_v22 = vmul.f32 %v123_v13, %v91_v44  ;;  %v125_v23 = vadd.f32 1.0, %v183_v14  ;;  %v96_v35 = vmul.f32 0.5, %v243_v31  ;;  %194 = vtanh.f32 %v83_v24 }
  0x17   :  { %v187_v26 = vpop.eup %186  ;;  %154 = vst [vmem:[%s350_s1 + $0x10] sm:$0xff] %v138_v15  ;;  %v140_v27 = vmul.f32 %v124_v19, %v92_v48  ;;  %v126_v28 = vadd.f32 1.0, %v185_v21  ;;  %v84_v38 = vmul.f32 %v68_v29, %v267_v51  ;;  %v53_v40 = vmul.f32 0.035677407, %v37_v30 }
  0x18   :  { %155 = vst [vmem:[%s350_s1 + $0x18] sm:$0xff] %v139_v22  ;;  %v141_v33 = vmul.f32 %v125_v23, %v93_v52  ;;  %v127_v34 = vadd.f32 1.0, %v187_v26  ;;  %v189_v36 = vpop.eup %188  ;;  %v38_v41 = vmul.f32 %v22_v25, %v22_v25  ;;  %v97_v45 = vmul.f32 0.5, %v248_v39 }
  0x19   :  { %156 = vst [vmem:[%s350_s1 + $0x20] sm:$0xff] %v140_v27  ;;  %v142_v37 = vmul.f32 %v126_v28, %v94_v59  ;;  %v128_v44 = vadd.f32 1.0, %v189_v36  ;;  %v39_v31 = vmul.f32 %v23_v32, %v23_v32  ;;  %v98_v48 = vmul.f32 0.5, %v255_v43 }
  0x1a   :  { %157 = vst [vmem:[%s350_s1 + $0x28] sm:$0xff] %v141_v33  ;;  %v143_v42 = vmul.f32 %v127_v34, %v95_v4  ;;  %v191_v46 = vpop.eup %190  ;;  %196 = vtanh.f32 %v84_v38  ;;  %v69_v49 = vadd.f32 0.7978846, %v53_v40  ;;  %v54_v50 = vmul.f32 0.035677407, %v38_v41 }
  0x1b   :  { %158 = vst [vmem:[%s350_s1 + $0x30] sm:$0xff] %v142_v37  ;;  %v193_v52 = vpop.eup %192  ;;  %v144_v53 = vmul.f32 %v128_v44, %v96_v35  ;;  %v129_v54 = vadd.f32 1.0, %v191_v46  ;;  %v55_v55 = vmul.f32 0.035677407, %v39_v31  ;;  %v99_v56 = vmul.f32 0.5, %v260_v47 }
  0x1c   :  { %159 = vst [vmem:[%s350_s1 + $0x38] sm:$0xff] %v143_v42  ;;  %v130_v39 = vadd.f32 1.0, %v193_v52  ;;  %v85_v57 = vmul.f32 %v69_v49, %v282_v18  ;;  %v70_v58 = vadd.f32 0.7978846, %v54_v50  ;;  %v195_v59 = vpop.eup %194  ;;  %v100_v47 = vmul.f32 0.5, %v267_v51 }
  0x1d   :  { %160 = vst [vmem:[%s350_s1 + $0x40] sm:$0xff] %v144_v53  ;;  %v145_v43 = vmul.f32 %v129_v54, %v97_v45  ;;  %v71_v60 = vadd.f32 0.7978846, %v55_v55  ;;  %v131_v62 = vadd.f32 1.0, %v195_v59  ;;  %v101_v5 = vmul.f32 0.5, %v282_v18 }
  0x1e   :  { %v146_v61 = vmul.f32 %v130_v39, %v98_v48  ;;  %198 = vtanh.f32 %v85_v57  ;;  %v86_v63 = vmul.f32 %v70_v58, %v22_v25  ;;  %v102_v7 = vmul.f32 0.5, %v22_v25 }
  0x1f   :  { %161 = vst [vmem:[%s350_s1 + $0x48] sm:$0xff] %v145_v43  ;;  %v87_v0 = vmul.f32 %v71_v60, %v23_v32  ;;  %v147_v2 = vmul.f32 %v131_v62, %v99_v56  ;;  %v103_v9 = vmul.f32 0.5, %v23_v32 }
  0x20   :  { %v197_v1 = vpop.eup %196  ;;  %162 = vst [vmem:[%s350_s1 + $0x50] sm:$0xff] %v146_v61  ;;  %200 = vtanh.f32 %v86_v63 }
  0x21   :  { %v132_v3 = vadd.f32 1.0, %v197_v1  ;;  %202 = vtanh.f32 %v87_v0  ;;  %163 = vst [vmem:[%s350_s1 + $0x58] sm:$0xff] %v147_v2 }
  0x23   :  { %v148_v4 = vmul.f32 %v132_v3, %v100_v47 }
  0x24   :  { %v199_v6 = vpop.eup %198 }
  0x25   :  { %164 = vst [vmem:[%s350_s1 + $0x60] sm:$0xff] %v148_v4  ;;  %v133_v51 = vadd.f32 1.0, %v199_v6 }
  0x26   :  { %v201_v8 = vpop.eup %200 }
  0x27   :  { %v203_v10 = vpop.eup %202  ;;  %v149_v11 = vmul.f32 %v133_v51, %v101_v5  ;;  %v134_v12 = vadd.f32 1.0, %v201_v8 }
  0x28   :  { %v135_v13 = vadd.f32 1.0, %v203_v10 }
  0x29   :  { %165 = vst [vmem:[%s350_s1 + $0x68] sm:$0xff] %v149_v11  ;;  %v150_v16 = vmul.f32 %v134_v12, %v102_v7 }
  0x2a   :  { %v151_v17 = vmul.f32 %v135_v13, %v103_v9 }
  0x2b   :  { %166 = vst [vmem:[%s350_s1 + $0x70] sm:$0xff] %v150_v16 }
  0x2c   :  { %167 = vst [vmem:[%s350_s1 + $0x78] sm:$0xff] %v151_v17 }

</bundles_post_ra>
